<compile_context>
chip_gen: v5e
topology: v5e:2x2
jax: 0.10.0
libtpu: 0.0.40
codegen_flags: <defaults>
</compile_context>

<pallas_src>
import jax
import jax.numpy as jnp
from jax.experimental import pallas as pl
from jax.experimental.pallas import tpu as pltpu


def _round_up(n, m):
    return ((n + m - 1) // m) * m


# ----------------------------------------------------------------------------
# Fused Pallas kernel: global one-hot + (embedding-folded) MLP
# ----------------------------------------------------------------------------
def _make_fused_kernel(vocab_offsets, num_layers, cast_bf16):
    num_features = len(vocab_offsets)
    compute_dtype = jnp.bfloat16 if cast_bf16 else jnp.float32

    def kernel(*refs):
        x_ref = refs[0]                                      # (TB, F) int32
        w_refs = refs[1:1 + num_layers]                      # resident weights
        b_refs = refs[1 + num_layers:1 + 2 * num_layers]     # (1, Dout) f32
        o_ref = refs[1 + 2 * num_layers]                     # (TB, out_pad)

        idx = x_ref[...]                                     # (TB, F) int32
        tb = idx.shape[0]
        v_pad = w_refs[0].shape[0]                           # 128-padded vocab

        # ---- One global one-hot over the concatenated vocab (shared iota) ---
        iota = jax.lax.broadcasted_iota(jnp.int32, (tb, v_pad), 1)
        mask = iota == (idx[:, 0:1] + vocab_offsets[0])
        for f in range(1, num_features):
            mask = jnp.logical_or(mask, iota == (idx[:, f:f + 1] + vocab_offsets[f]))
        h = mask.astype(compute_dtype)                       # (TB, v_pad)

        # embedding_dropout & per-layer Dropout(p): identity in eval mode.

        # ---- MLP: layer 0 has the block-diag embedding folded into it -------
        for li in range(num_layers):
            w = w_refs[li][...]                              # (Din, Dout) f32/bf16
            b = b_refs[li][...]                              # (1, Dout)   f32
            lhs = h if li == 0 else (h.astype(jnp.bfloat16) if cast_bf16 else h)
            y = jnp.dot(lhs, w, preferred_element_type=jnp.float32) + b
            if li != num_layers - 1:
                y = jnp.maximum(y, 0.0)
            h = y

        o_ref[...] = h.astype(o_ref.dtype)

    return kernel


def make_fused_forward(output_size, vocab_offsets, *, cast_mxu_bf16=False,
                       max_tile_b=512):
    """Builds a jitted forward: (weights, biases, x) -> (batch, output_size)."""

    @jax.jit
    def fwd(weights, biases, x):
        B, F = x.shape
        num_layers = len(weights)
        out_pad = int(weights[-1].shape[1])                  # small (e.g. 8)

        # Tile selection that minimizes batch padding.
        n_tiles = -(-B // max_tile_b)
        tb = _round_up(-(-B // n_tiles), 8)
        B_pad = n_tiles * tb
        x_p = jnp.pad(x, ((0, B_pad - B), (0, 0)))           # pad rows = index 0

        in_specs = [pl.BlockSpec((tb, F), lambda i: (i, 0))]
        in_specs += [pl.BlockSpec(tuple(w.shape), lambda i: (0, 0)) for w in weights]
        in_specs += [pl.BlockSpec(tuple(b.shape), lambda i: (0, 0)) for b in biases]

        kernel = _make_fused_kernel(vocab_offsets, num_layers, cast_mxu_bf16)

        out_full = pl.pallas_call(
            kernel,
            out_shape=jax.ShapeDtypeStruct((B_pad, out_pad), jnp.float32),
            grid=(n_tiles,),
            in_specs=in_specs,
            out_specs=pl.BlockSpec((tb, out_pad), lambda i: (i, 0)),
            compiler_params=pltpu.CompilerParams(
                dimension_semantics=("parallel",)
            ),
        )(x_p, *weights, *biases)

        return out_full[:B, :output_size]

    return fwd


# ----------------------------------------------------------------------------
# Parameters (PyTorch-equivalent init) + packing for the fused kernel
# ----------------------------------------------------------------------------
def init_params(key, embedding_size, output_size, hidden_size):
    params = {"embeddings": [], "linears": []}
    total_embed = sum(e for _, e in embedding_size)

    for (vocab, edim) in embedding_size:
        key, sub = jax.random.split(key)
        # nn.Embedding default init: N(0, 1)
        params["embeddings"].append(
            jax.random.normal(sub, (vocab, edim), dtype=jnp.float32)
        )

    in_dim = total_embed
    dims = list(hidden_size) + [output_size]
    for out_dim in dims:
        key, kw, kb = jax.random.split(key, 3)
        bound = 1.0 / jnp.sqrt(in_dim)
        # stored as (in, out)  ==  PyTorch weight.T
        w = jax.random.uniform(kw, (in_dim, out_dim), jnp.float32, -bound, bound)
        b = jax.random.uniform(kb, (out_dim,), jnp.float32, -bound, bound)
        params["linears"].append((w, b))
        in_dim = out_dim
    return params


def pack_fused_params(params, embedding_size, output_size, *,
                      cast_mxu_bf16=False, vocab_lane_pad=128):
    """Pack params for the fused eval-mode kernel.

    Layer 0 weight = (block-diagonal embedding matrix) @ W1, zero-padded to a
    128-multiple of rows (so the in-kernel one-hot is lane-dense); its bias is
    b1.  The final layer is zero-padded on the output axis to a multiple of 8.
    Biases are separate f32 (1, Dout) arrays; weights are optionally bf16.
    """
    vocab_sizes = [v for v, _ in embedding_size]
    vocab_offsets = [0]
    for v in vocab_sizes[:-1]:
        vocab_offsets.append(vocab_offsets[-1] + v)
    v_total = sum(vocab_sizes)
    v_pad = _round_up(max(v_total, vocab_lane_pad), vocab_lane_pad)

    n = len(params["linears"])
    out_pad = _round_up(output_size, 8)

    # --- fold embeddings into the first Linear (eval mode: dropout = id) -----
    w1, b1 = params["linears"][0]
    h0 = w1.shape[1]
    w0_fold = jnp.zeros((v_pad, h0), jnp.float32)
    e_off = 0
    for f, table in enumerate(params["embeddings"]):
        vocab, edim = table.shape
        piece = jnp.dot(jnp.asarray(table, jnp.float32),
                        w1[e_off:e_off + edim, :],
                        precision=jax.lax.Precision.HIGHEST)
        w0_fold = w0_fold.at[vocab_offsets[f]:vocab_offsets[f] + vocab, :].set(piece)
        e_off += edim
    b1 = jnp.asarray(b1, jnp.float32)
    if n == 1:  # first layer is also the output layer
        w0_fold = jnp.pad(w0_fold, ((0, 0), (0, out_pad - h0)))
        b1 = jnp.pad(b1, (0, out_pad - h0))

    weights = [w0_fold]
    biases = [b1[None, :]]

    for li in range(1, n):
        w, b = params["linears"][li]
        w = jnp.asarray(w, jnp.float32)
        b = jnp.asarray(b, jnp.float32)
        if li == n - 1:
            dout = w.shape[1]
            w = jnp.pad(w, ((0, 0), (0, out_pad - dout)))
            b = jnp.pad(b, (0, out_pad - dout))
        weights.append(w)
        biases.append(b[None, :])

    if cast_mxu_bf16:
        # Hoisted constant cast: bf16 weights (halves VMEM/DMA), biases stay f32.
        weights = [w.astype(jnp.bfloat16) for w in weights]

    return weights, biases, tuple(vocab_offsets), out_pad


# ----------------------------------------------------------------------------
# Main
# ----------------------------------------------------------------------------
if __name__ == "__main__":
    # Module configuration (small, consistent with the forward pass).
    embedding_size = [(10, 8), (7, 8), (5, 16)]   # (vocab, embed_dim) per feature
    hidden_size = [32, 16]
    output_size = 4
    batch = 8

    key = jax.random.PRNGKey(0)
    key, pkey, xkey = jax.random.split(key, 3)

    params = init_params(pkey, embedding_size, output_size, hidden_size)

    # Categorical index inputs: x[:, i] in [0, vocab_i)
    cols = []
    for i, (vocab, _) in enumerate(embedding_size):
        xkey, sub = jax.random.split(xkey)
        cols.append(jax.random.randint(sub, (batch,), 0, vocab, dtype=jnp.int32))
    x = jnp.stack(cols, axis=1)   # (batch, num_features) int32

    # Pure-JAX reference for the whole (eval-mode) forward pass.
    h_ref = jnp.concatenate(
        [jnp.take(t, x[:, i], axis=0) for i, t in enumerate(params["embeddings"])],
        axis=1,
    )
    for li, (w, b) in enumerate(params["linears"]):
        h_ref = h_ref @ w + b
        if li != len(params["linears"]) - 1:
            h_ref = jnp.maximum(h_ref, 0.0)

    # Exact (f32-MXU-operand) fused forward.
    weights, biases, vocab_offsets, _ = pack_fused_params(
        params, embedding_size, output_size, cast_mxu_bf16=False)
    fwd_f32 = make_fused_forward(output_size, vocab_offsets, cast_mxu_bf16=False)
    out = jax.block_until_ready(fwd_f32(weights, biases, x))

    assert out.shape == (batch, output_size), out.shape
    assert out.dtype == jnp.float32
    assert jnp.allclose(out, h_ref, atol=1e-4, rtol=1e-4)

    # bf16-MXU-operand path (throughput mode for scaled batch); weights are
    # bf16 host-side, accumulation / bias / ReLU stay f32.
    weights_bf, biases_bf, vocab_offsets, _ = pack_fused_params(
        params, embedding_size, output_size, cast_mxu_bf16=True)
    fwd_bf16 = make_fused_forward(output_size, vocab_offsets, cast_mxu_bf16=True)
    out_bf16 = jax.block_until_ready(fwd_bf16(weights_bf, biases_bf, x))
    assert out_bf16.shape == (batch, output_size)
    assert jnp.allclose(out_bf16, h_ref, atol=1e-1, rtol=1e-1)

    print("KERNEL_OK")
</pallas_src>

<mosaic_0001>
module attributes {stable_mosaic.version = 11 : i64} {
  func.func @kernel(%arg0: i32, %arg1: memref<8x3xi32, #tpu.memory_space<vmem>>, %arg2: memref<128x32xf32, #tpu.memory_space<vmem>>, %arg3: memref<32x16xf32, #tpu.memory_space<vmem>>, %arg4: memref<16x8xf32, #tpu.memory_space<vmem>>, %arg5: memref<1x32xf32, #tpu.memory_space<vmem>>, %arg6: memref<1x16xf32, #tpu.memory_space<vmem>>, %arg7: memref<1x8xf32, #tpu.memory_space<vmem>>, %arg8: memref<8x8xf32, #tpu.memory_space<vmem>>) attributes {dimension_semantics = [#tpu.dimension_semantics<parallel>], iteration_bounds = array<i64: 1>, scalar_prefetch = 0 : i64, scratch_operands = 0 : i64, tpu.core_type = #tpu.core_type<tc>, window_params = [{transform_indices = @transform_0, window_bounds = array<i64: 8, 3>}, {pipeline_mode = #tpu.pipeline_mode<synchronous>, transform_indices = @transform_1, window_bounds = array<i64: 128, 32>}, {pipeline_mode = #tpu.pipeline_mode<synchronous>, transform_indices = @transform_2, window_bounds = array<i64: 32, 16>}, {pipeline_mode = #tpu.pipeline_mode<synchronous>, transform_indices = @transform_3, window_bounds = array<i64: 16, 8>}, {pipeline_mode = #tpu.pipeline_mode<synchronous>, transform_indices = @transform_4, window_bounds = array<i64: 1, 32>}, {pipeline_mode = #tpu.pipeline_mode<synchronous>, transform_indices = @transform_5, window_bounds = array<i64: 1, 16>}, {pipeline_mode = #tpu.pipeline_mode<synchronous>, transform_indices = @transform_6, window_bounds = array<i64: 1, 8>}, {transform_indices = @transform_7, window_bounds = array<i64: 8, 8>}]} {
    %c0 = arith.constant 0 : index
    %c0_0 = arith.constant 0 : index
    %0 = vector.load %arg1[%c0, %c0_0] : memref<8x3xi32, #tpu.memory_space<vmem>>, vector<8x3xi32>
    %1 = tpu.iota {dimensions = array<i32: 1>} : vector<8x128xi32>
    %2 = vector.extract_strided_slice %0 {offsets = [0, 0], sizes = [8, 1], strides = [1, 1]} : vector<8x3xi32> to vector<8x1xi32>
    %c0_i32 = arith.constant 0 : i32
    %3 = vector.broadcast %c0_i32 : i32 to vector<8x1xi32>
    %4 = arith.addi %2, %3 : vector<8x1xi32>
    %5 = vector.broadcast %4 : vector<8x1xi32> to vector<8x128xi32>
    %6 = arith.cmpi eq, %1, %5 : vector<8x128xi32>
    %7 = vector.extract_strided_slice %0 {offsets = [0, 1], sizes = [8, 1], strides = [1, 1]} : vector<8x3xi32> to vector<8x1xi32>
    %c10_i32 = arith.constant 10 : i32
    %8 = vector.broadcast %c10_i32 : i32 to vector<8x1xi32>
    %9 = arith.addi %7, %8 : vector<8x1xi32>
    %10 = vector.broadcast %9 : vector<8x1xi32> to vector<8x128xi32>
    %11 = arith.cmpi eq, %1, %10 : vector<8x128xi32>
    %12 = arith.ori %6, %11 : vector<8x128xi1>
    %13 = vector.extract_strided_slice %0 {offsets = [0, 2], sizes = [8, 1], strides = [1, 1]} : vector<8x3xi32> to vector<8x1xi32>
    %c17_i32 = arith.constant 17 : i32
    %14 = vector.broadcast %c17_i32 : i32 to vector<8x1xi32>
    %15 = arith.addi %13, %14 : vector<8x1xi32>
    %16 = vector.broadcast %15 : vector<8x1xi32> to vector<8x128xi32>
    %17 = arith.cmpi eq, %1, %16 : vector<8x128xi32>
    %18 = arith.ori %12, %17 : vector<8x128xi1>
    %19 = arith.extui %18 : vector<8x128xi1> to vector<8x128xi32>
    %20 = arith.sitofp %19 : vector<8x128xi32> to vector<8x128xf32>
    %c0_1 = arith.constant 0 : index
    %c0_2 = arith.constant 0 : index
    %21 = vector.load %arg2[%c0_1, %c0_2] : memref<128x32xf32, #tpu.memory_space<vmem>>, vector<128x32xf32>
    %c0_3 = arith.constant 0 : index
    %c0_4 = arith.constant 0 : index
    %22 = vector.load %arg5[%c0_3, %c0_4] : memref<1x32xf32, #tpu.memory_space<vmem>>, vector<1x32xf32>
    %cst = arith.constant dense<0.000000e+00> : vector<8x32xf32>
    %23 = tpu.matmul %20, %21, %cst {dimension_numbers = #tpu.dot_dimension_numbers<[1], [0], [0], [1], [0, 0, 1, 1], [], []>} : vector<8x128xf32>, vector<128x32xf32>, vector<8x32xf32> -> vector<8x32xf32>
    %24 = vector.broadcast %22 : vector<1x32xf32> to vector<8x32xf32>
    %25 = arith.addf %23, %24 : vector<8x32xf32>
    %cst_5 = arith.constant 0.000000e+00 : f32
    %26 = vector.broadcast %cst_5 : f32 to vector<8x32xf32>
    %27 = arith.maximumf %25, %26 : vector<8x32xf32>
    %c0_6 = arith.constant 0 : index
    %c0_7 = arith.constant 0 : index
    %28 = vector.load %arg3[%c0_6, %c0_7] : memref<32x16xf32, #tpu.memory_space<vmem>>, vector<32x16xf32>
    %c0_8 = arith.constant 0 : index
    %c0_9 = arith.constant 0 : index
    %29 = vector.load %arg6[%c0_8, %c0_9] : memref<1x16xf32, #tpu.memory_space<vmem>>, vector<1x16xf32>
    %cst_10 = arith.constant dense<0.000000e+00> : vector<8x16xf32>
    %30 = tpu.matmul %27, %28, %cst_10 {dimension_numbers = #tpu.dot_dimension_numbers<[1], [0], [0], [1], [0, 0, 1, 1], [], []>} : vector<8x32xf32>, vector<32x16xf32>, vector<8x16xf32> -> vector<8x16xf32>
    %31 = vector.broadcast %29 : vector<1x16xf32> to vector<8x16xf32>
    %32 = arith.addf %30, %31 : vector<8x16xf32>
    %cst_11 = arith.constant 0.000000e+00 : f32
    %33 = vector.broadcast %cst_11 : f32 to vector<8x16xf32>
    %34 = arith.maximumf %32, %33 : vector<8x16xf32>
    %c0_12 = arith.constant 0 : index
    %c0_13 = arith.constant 0 : index
    %35 = vector.load %arg4[%c0_12, %c0_13] : memref<16x8xf32, #tpu.memory_space<vmem>>, vector<16x8xf32>
    %c0_14 = arith.constant 0 : index
    %c0_15 = arith.constant 0 : index
    %36 = vector.load %arg7[%c0_14, %c0_15] : memref<1x8xf32, #tpu.memory_space<vmem>>, vector<1x8xf32>
    %cst_16 = arith.constant dense<0.000000e+00> : vector<8x8xf32>
    %37 = tpu.matmul %34, %35, %cst_16 {dimension_numbers = #tpu.dot_dimension_numbers<[1], [0], [0], [1], [0, 0, 1, 1], [], []>} : vector<8x16xf32>, vector<16x8xf32>, vector<8x8xf32> -> vector<8x8xf32>
    %38 = vector.broadcast %36 : vector<1x8xf32> to vector<8x8xf32>
    %39 = arith.addf %37, %38 : vector<8x8xf32>
    %c0_17 = arith.constant 0 : index
    %c0_18 = arith.constant 0 : index
    %40 = vector.load %arg8[%c0_17, %c0_18] : memref<8x8xf32, #tpu.memory_space<vmem>>, vector<8x8xf32>
    tpu.vector_store %arg8[%c0_17, %c0_18], %39 {strides = array<i32>} : memref<8x8xf32, #tpu.memory_space<vmem>>, vector<8x8xf32>,
    return
  }
  func.func @transform_0(%arg0: i32) -> (i32, i32) {
    %c0_i32 = arith.constant 0 : i32
    %c0_i32_0 = arith.constant 0 : i32
    return %arg0, %c0_i32 : i32, i32
  }
  func.func @transform_1(%arg0: i32) -> (i32, i32) {
    %c0_i32 = arith.constant 0 : i32
    %c0_i32_0 = arith.constant 0 : i32
    %c0_i32_1 = arith.constant 0 : i32
    return %c0_i32, %c0_i32_0 : i32, i32
  }
  func.func @transform_2(%arg0: i32) -> (i32, i32) {
    %c0_i32 = arith.constant 0 : i32
    %c0_i32_0 = arith.constant 0 : i32
    %c0_i32_1 = arith.constant 0 : i32
    return %c0_i32, %c0_i32_0 : i32, i32
  }
  func.func @transform_3(%arg0: i32) -> (i32, i32) {
    %c0_i32 = arith.constant 0 : i32
    %c0_i32_0 = arith.constant 0 : i32
    %c0_i32_1 = arith.constant 0 : i32
    return %c0_i32, %c0_i32_0 : i32, i32
  }
  func.func @transform_4(%arg0: i32) -> (i32, i32) {
    %c0_i32 = arith.constant 0 : i32
    %c0_i32_0 = arith.constant 0 : i32
    %c0_i32_1 = arith.constant 0 : i32
    return %c0_i32, %c0_i32_0 : i32, i32
  }
  func.func @transform_5(%arg0: i32) -> (i32, i32) {
    %c0_i32 = arith.constant 0 : i32
    %c0_i32_0 = arith.constant 0 : i32
    %c0_i32_1 = arith.constant 0 : i32
    return %c0_i32, %c0_i32_0 : i32, i32
  }
  func.func @transform_6(%arg0: i32) -> (i32, i32) {
    %c0_i32 = arith.constant 0 : i32
    %c0_i32_0 = arith.constant 0 : i32
    %c0_i32_1 = arith.constant 0 : i32
    return %c0_i32, %c0_i32_0 : i32, i32
  }
  func.func @transform_7(%arg0: i32) -> (i32, i32) {
    %c0_i32 = arith.constant 0 : i32
    %c0_i32_0 = arith.constant 0 : i32
    return %arg0, %c0_i32 : i32, i32
  }
}

</mosaic_0001>

<bundles_post_ra>
// kernel: fwd.1
= control target key start
LH: loop header
LB: loop body
LE: loop exit
PB: predicated region body
PF: predicated region fallthrough
CT: control target
= control target key end

     0   :  { %v172_v0 = vmov 0   ;;  %v173_v2 = vmov 2   ;;  %v174_v11 = vmov 1   ;;  %v27_v24 = vlaneseq  ;;  %s297_s0 = inlined_call_operand.vmem [shape: s32[8,3], index: 0, kind: input, shape index: {}]   ;;  %s298_s1 = inlined_call_operand.vmem [shape: f32[128,32], index: 1, kind: input, shape index: {}]   ;;  %s299_s4 = inlined_call_operand.vmem [shape: f32[1,32], index: 4, kind: input, shape index: {}]   ;;  %s300_s2 = inlined_call_operand.vmem [shape: f32[32,16], index: 2, kind: input, shape index: {}]   ;;  %s301_s5 = inlined_call_operand.vmem [shape: f32[1,16], index: 5, kind: input, shape index: {}]   ;;  %s302_s6 = inlined_call_operand.vmem [shape: f32[1,8], index: 6, kind: input, shape index: {}]   ;;  %s303_s3 = inlined_call_operand.vmem [shape: f32[16,8], index: 3, kind: input, shape index: {}]   ;;  %s304_s7 = inlined_call_operand.vmem [shape: f32[8,8], index: 7, kind: output, shape index: {}]  }
   0x1   :  { %165 = vset.pattern.permute.xlu0 %v172_v0  ;;  %v26_v1 = vld [vmem:[%s297_s0] sm:$0xff]  ;;  %167 = vset.pattern.permute.xlu1 %v173_v2  ;;  %v62_v3 = vld [vmem:[%s298_s1 + $0x78] sm:$0xff]  ;;  %v61_v4 = vld [vmem:[%s298_s1 + $0x70] sm:$0xff]  ;;  %v175_v28 = vmov 1.0   ;;  %vm96_vm5 = vcmask 261120   ;;  %vm127_vm6 = vcmask 130048  }
   0x2   :  { %30 = vperm.xlu0 %165, %v26_v1   ;;  %v39_v5 = vadd.s32 17, %v26_v1  ;;  %67 = vmatpush.msra.mxu0 %v62_v3  ;;  %v60_v6 = vld [vmem:[%s298_s1 + $0x68] sm:$0xff]  ;;  %v59_v7 = vld [vmem:[%s298_s1 + $0x60] sm:$0xff]  ;;  %v33_v8 = vadd.s32 10, %v26_v1  ;;  %v58_v9 = vld [vmem:[%s298_s1 + $0x58] sm:$0xff]  ;;  %v28_v25 = vand.u32 127, %v27_v24 }
   0x3   :  { %v57_v10 = vld [vmem:[%s298_s1 + $0x50] sm:$0xff]  ;;  %v56_v12 = vld [vmem:[%s298_s1 + $0x48] sm:$0xff]  ;;  %v55_v13 = vld [vmem:[%s298_s1 + $0x40] sm:$0xff]  ;;  %vm151_vm7 = vcmask 64512  }
   0x4   :  { %41 = vperm.xlu1 %167, %v39_v5   ;;  %68 = vmatpush.msra.mxu0 %v61_v4  ;;  %v54_v14 = vld [vmem:[%s298_s1 + $0x38] sm:$0xff]  ;;  %v53_v15 = vld [vmem:[%s298_s1 + $0x30] sm:$0xff]  ;;  %v52_v16 = vld [vmem:[%s298_s1 + $0x28] sm:$0xff] }
   0x5   :  { %v51_v17 = vld [vmem:[%s298_s1 + $0x20] sm:$0xff]  ;;  %v50_v18 = vld [vmem:[%s298_s1 + $0x18] sm:$0xff]  ;;  %v49_v19 = vld [vmem:[%s298_s1 + $0x10] sm:$0xff] }
   0x6   :  { %69 = vmatpush.msra.mxu0 %v60_v6  ;;  %v48_v20 = vld [vmem:[%s298_s1 + $0x8] sm:$0xff]  ;;  %v47_v21 = vld [vmem:[%s298_s1] sm:$0xff]  ;;  %v91_v22 = vld [vmem:[%s300_s2 + $0x18] sm:$0xff] }
   0x7   :  { %112 = vmatpush.msra.mxu1 %v91_v22  ;;  %v90_v29 = vld [vmem:[%s300_s2 + $0x10] sm:$0xff]  ;;  %v89_v30 = vld [vmem:[%s300_s2 + $0x8] sm:$0xff]  ;;  %v88_v31 = vld [vmem:[%s300_s2] sm:$0xff] }
   0x8   :  { %70 = vmatpush.msra.mxu0 %v59_v7  ;;  %v169_v32 = vld [vmem:[%s299_s4] ss:$0 sm:$0xff]  ;;  %v122_v36 = vld [vmem:[%s303_s3 + $0x8] sm:$0xff] }
   0x9   :  { %113 = vmatpush.msra.mxu1 %v90_v29  ;;  %145 = vmatpush.msra.mxu2 %v122_v36  ;;  %v121_v37 = vld [vmem:[%s303_s3] sm:$0xff] }
   0xa   :  { %166 = vset.pattern.permute.xlu0 %v174_v11  ;;  %71 = vmatpush.msra.mxu0 %v58_v9  ;;  %v170_v38 = vld [vmem:[%s301_s5] ss:$0 sm:$0xff] }
   0xb   :  { %35 = vperm.xlu0 %166, %v33_v8   ;;  %114 = vmatpush.msra.mxu1 %v89_v30  ;;  %v171_v42 = vld [vmem:[%s302_s6] ss:$0 sm:$0xff] }
   0xc   :  { %72 = vmatpush.msra.mxu0 %v57_v10  ;;  %146 = vmatpush.msra.mxu2 %v121_v37 }
   0xd   :  { %115 = vmatpush.msra.mxu1 %v88_v31 }
   0xe   :  { %73 = vmatpush.msra.mxu0 %v56_v12 }
  0x10   :  { %74 = vmatpush.msra.mxu0 %v55_v13 }
  0x12   :  { %75 = vmatpush.msra.mxu0 %v54_v14 }
  0x13   :  { %168 = vset.pattern.permute.xlu0 %v173_v2 }
  0x14   :  { %76 = vmatpush.msra.mxu0 %v53_v15 }
  0x16   :  { %77 = vmatpush.msra.mxu0 %v52_v16 }
  0x18   :  { %78 = vmatpush.msra.mxu0 %v51_v17 }
  0x1a   :  { %79 = vmatpush.msra.mxu0 %v50_v18 }
  0x1c   :  { %80 = vmatpush.msra.mxu0 %v49_v19 }
  0x1e   :  { %81 = vmatpush.msra.mxu0 %v48_v20 }
  0x20   :  { %82 = vmatpush.msra.mxu0 %v47_v21 }
  0x74   :  { %v31_v23 = vpop.permute.xlu0 %30 }
  0x75   :  { %vm32_vm1 = vcmp.eq.s32.totalorder %v28_v25, %v31_v23 }
  0x76   :  { %v42_v26 = vpop.permute.xlu1 %41 }
  0x77   :  { %vm43_vm0 = vcmp.eq.s32.totalorder %v28_v25, %v42_v26 }
  0x7d   :  { %v36_v27 = vpop.permute.xlu0 %35 }
  0x7e   :  { %vm37_vm2 = vcmp.eq.s32.totalorder %v28_v25, %v36_v27 }
  0x7f   :  { %vm38_vm3 = vmor %vm32_vm1, %vm37_vm2 }
  0x80   :  { %vm44_vm4 = vmor %vm38_vm3, %vm43_vm0 }
  0x81   :  { %158 = vmatmul.msk.f32.vlgmr.msra.gmra.mxu0 %vm44_vm4, %v175_v28 }
  0xfe   :  { %v84_v33 = vpop.f32.mrf.mxu0 }
  0xff   :  { %v85_v34 = vadd.f32 %v169_v32, %v84_v33 }
 0x101   :  { %v87_v35 = vmax.f32 %v85_v34, 0.0 }
 0x103   :  { %159 = vmatmul.msk.f32.vlgmr.msra.gmra.mxu1 %vm96_vm5, %v87_v35 }
 0x180   :  { %v117_v39 = vpop.f32.mrf.mxu1 }
 0x181   :  { %v118_v40 = vadd.f32 %v170_v38, %v117_v39 }
 0x183   :  { %v120_v41 = vmax.f32 %v118_v40, 0.0 }
 0x185   :  { %160 = vmatmul.msk.f32.vlgmr.msra.gmra.mxu2 %vm127_vm6, %v120_v41 }
 0x208   :  { %v148_v43 = vpop.f32.mrf.mxu2 }
 0x209   :  { %v149_v44 = vadd.f32 %v171_v42, %v148_v43 }
 0x20b   :  { %152 = vst.msk [vmem:[%s304_s7] sm:$0xff] %vm151_vm7, %v149_v44 }

</bundles_post_ra>
